<compile_context>
chip_gen: v7x
topology: tpu7x:2x2x1
jax: 0.10.0
libtpu: 0.0.40
codegen_flags: <defaults>
</compile_context>

<pallas_src>
import functools

import jax
import jax.numpy as jnp
from jax import lax
from jax.experimental import pallas as pl
from jax.experimental.pallas import tpu as pltpu


# ----------------------------------------------------------------------------
# Pallas rollout kernel (single program, candidates on the lane axis)
# ----------------------------------------------------------------------------
def _rollout_kernel(s0_ref, act_ref, wsT_ref, waT_ref, b_ref, sum_ref, *,
                    horizon):
    """Roll out `horizon` timesteps for all candidates at once.

    s0_ref:  [S, N]    initial (candidate-expanded) state, candidates on lanes
    act_ref: [H, A, N] sampled actions, candidates on lanes
    wsT_ref: [S, S]    transposed transition weight (nxt = wsT @ state)
    waT_ref: [S, A]    transposed action projection
    b_ref:   [S, 1]    transition bias (column)
    sum_ref: [S, N]    output: sum over timesteps of the rolled-out state
    """
    wsT = wsT_ref[...]
    waT = waT_ref[...]
    # Hoist the lane-broadcast of the bias out of the unrolled loop.
    bias = jnp.broadcast_to(b_ref[...], s0_ref.shape)          # [S, N]
    state0 = s0_ref[...]

    def step(t, carry):
        state, acc = carry
        drive = jnp.dot(waT, act_ref[t],
                        preferred_element_type=jnp.float32) + bias
        nxt = jnp.tanh(
            jnp.dot(wsT, state, preferred_element_type=jnp.float32) + drive)
        return nxt, acc + nxt

    _, acc = lax.fori_loop(
        0, horizon, step,
        (state0, jnp.zeros(s0_ref.shape, jnp.float32)),
        unroll=True)
    sum_ref[...] = acc


def rollout_returns(init_state, actions, W_s, W_a, b, w_r):
    """Per-candidate accumulated reward, shape [N, 1]."""
    H, N, A = actions.shape
    S = init_state.shape[1]

    # Transposed, lane-dense layout: candidate dimension on the 128-lane axis.
    s0T = init_state.T.astype(jnp.float32)                     # [S, N]
    actT = jnp.transpose(actions, (0, 2, 1)).astype(jnp.float32)  # [H, A, N]
    wsT = W_s.T.astype(jnp.float32)                            # [S, S]
    waT = W_a.T.astype(jnp.float32)                            # [S, A]
    bT = b.T.astype(jnp.float32)                               # [S, 1]

    # Single-program call: everything (< 0.2 MiB) is resident in VMEM; no grid
    # loop overhead, no fake megacore split at this problem size.
    state_sum = pl.pallas_call(
        functools.partial(_rollout_kernel, horizon=H),
        out_shape=jax.ShapeDtypeStruct((S, N), jnp.float32),
        grid_spec=pltpu.PrefetchScalarGridSpec(
            num_scalar_prefetch=0,
            grid=(1,),
            in_specs=[
                pl.BlockSpec((S, N), lambda i: (0, 0)),        # init state^T
                pl.BlockSpec((H, A, N), lambda i: (0, 0, 0)),  # actions^T
                pl.BlockSpec((S, S), lambda i: (0, 0)),        # W_s^T
                pl.BlockSpec((S, A), lambda i: (0, 0)),        # W_a^T
                pl.BlockSpec((S, 1), lambda i: (0, 0)),        # b^T
            ],
            out_specs=pl.BlockSpec((S, N), lambda i: (0, 0)),
        ),
        compiler_params=pltpu.CompilerParams(
            dimension_semantics=("arbitrary",)),
    )(s0T, actT, wsT, waT, bT)

    # Reward is linear in state: sum_t(w_r^T @ state_t) == w_r^T @ sum_t state_t.
    return (w_r.T @ state_sum).T                                # [N, 1]


# Pure-JAX reference of the rollout (correctness sanity check).
def rollout_returns_ref(init_state, actions, W_s, W_a, b, w_r):
    def step(s, a_t):
        nxt = jnp.tanh(s @ W_s + a_t @ W_a + b)
        return nxt, nxt @ w_r
    _, rewards = lax.scan(step, init_state, actions)
    return rewards.sum(axis=0)  # [N, 1]


# ----------------------------------------------------------------------------
# CEM planner forward (mirrors CEMPlanner.forward)
# ----------------------------------------------------------------------------
def cem_planner_forward(state, key, params, *, action_size, planning_horizon,
                        optimization_iters, candidates, top_candidates,
                        min_action=-1.0, max_action=1.0):
    W_s, W_a, b, w_r = params
    obs = state['state']['obs']                       # [B, S]
    B, S = obs.shape
    N = B * candidates

    # _expand_state_by_candidates
    init_state = jnp.broadcast_to(obs[:, None, :], (B, candidates, S))
    init_state = init_state.reshape(N, S)

    # _init_action_sequence_params
    action_mean = jnp.zeros((planning_horizon, B, 1, action_size), jnp.float32)
    action_std = jnp.ones((planning_horizon, B, 1, action_size), jnp.float32)

    for _ in range(optimization_iters):
        # _sample_action_sequences
        key, sub = jax.random.split(key)
        noise = jax.random.normal(
            sub, (planning_horizon, B, candidates, action_size), jnp.float32)
        actions = action_mean + action_std * noise
        actions = actions.reshape(planning_horizon, N, action_size)
        actions = jnp.clip(actions, min_action, max_action)

        # rollout (Pallas kernel): transition + objective + return accumulation
        returns = rollout_returns(init_state, actions, W_s, W_a, b, w_r)
        returns = returns.reshape(B, candidates)

        # _refit_belief_to_topk
        _, topk = lax.top_k(returns, top_candidates)          # [B, K]
        topk = topk + candidates * jnp.arange(B)[:, None]
        best = actions[:, topk.reshape(-1)]                    # [H, B*K, A]
        best = best.reshape(planning_horizon, B, top_candidates, action_size)
        action_mean = best.mean(axis=2, keepdims=True)
        action_std = best.std(axis=2, keepdims=True)           # unbiased=False

    return jnp.squeeze(action_mean[0], axis=1)                 # [B, A]


# ----------------------------------------------------------------------------
# Main
# ----------------------------------------------------------------------------
if __name__ == "__main__":
    # Planner hyper-parameters (small shapes)
    action_size = 8
    planning_horizon = 8
    optimization_iters = 3
    candidates = 64
    top_candidates = 8
    batch = 2
    state_size = 32

    key = jax.random.PRNGKey(0)
    k_obs, k_ws, k_wa, k_b, k_wr, k_plan = jax.random.split(key, 6)

    # Deterministic synthetic parameters for transition_fn / objective_fn.
    W_s = 0.1 * jax.random.normal(k_ws, (state_size, state_size), jnp.float32)
    W_a = 0.1 * jax.random.normal(k_wa, (action_size, state_size), jnp.float32)
    b = 0.01 * jax.random.normal(k_b, (1, state_size), jnp.float32)
    w_r = jax.random.normal(k_wr, (state_size, 1), jnp.float32)
    params = (W_s, W_a, b, w_r)

    # Input state dict: {'state': {'obs': [B, S]}}
    obs = jax.random.normal(k_obs, (batch, state_size), jnp.float32)
    state = {'state': {'obs': obs}}

    # --- sanity check: Pallas rollout vs pure-JAX reference -----------------
    N = batch * candidates
    init_state = jnp.broadcast_to(
        obs[:, None, :], (batch, candidates, state_size)).reshape(N, state_size)
    test_actions = jnp.clip(
        jax.random.normal(jax.random.PRNGKey(1),
                          (planning_horizon, N, action_size), jnp.float32),
        -1.0, 1.0)
    got = jax.block_until_ready(rollout_returns(init_state, test_actions, *params))
    want = rollout_returns_ref(init_state, test_actions, *params)
    assert jnp.allclose(got, want, atol=1e-3, rtol=1e-3), \
        f"rollout mismatch: max abs err {jnp.max(jnp.abs(got - want))}"

    # --- full planner forward ------------------------------------------------
    plan = jax.jit(functools.partial(
        cem_planner_forward,
        action_size=action_size,
        planning_horizon=planning_horizon,
        optimization_iters=optimization_iters,
        candidates=candidates,
        top_candidates=top_candidates,
        min_action=-1.0,
        max_action=1.0,
    ))
    out = plan(state, k_plan, params)
    out = jax.block_until_ready(out)
    assert out.shape == (batch, action_size)
    assert bool(jnp.all(jnp.isfinite(out)))

    print("KERNEL_OK")
</pallas_src>

<mosaic_0001>
module attributes {stable_mosaic.version = 11 : i64} {
  func.func @_rollout_kernel(%arg0: i32, %arg1: memref<32x128xf32, #tpu.memory_space<vmem>>, %arg2: memref<8x8x128xf32, #tpu.memory_space<vmem>>, %arg3: memref<32x32xf32, #tpu.memory_space<vmem>>, %arg4: memref<32x8xf32, #tpu.memory_space<vmem>>, %arg5: memref<32x1xf32, #tpu.memory_space<vmem>>, %arg6: memref<32x128xf32, #tpu.memory_space<vmem>>) attributes {dimension_semantics = [#tpu.dimension_semantics<arbitrary>], iteration_bounds = array<i64: 1>, scalar_prefetch = 0 : i64, scratch_operands = 0 : i64, tpu.core_type = #tpu.core_type<tc>, window_params = [{pipeline_mode = #tpu.pipeline_mode<synchronous>, transform_indices = @transform_0, window_bounds = array<i64: 32, 128>}, {pipeline_mode = #tpu.pipeline_mode<synchronous>, transform_indices = @transform_1, window_bounds = array<i64: 8, 8, 128>}, {pipeline_mode = #tpu.pipeline_mode<synchronous>, transform_indices = @transform_2, window_bounds = array<i64: 32, 32>}, {pipeline_mode = #tpu.pipeline_mode<synchronous>, transform_indices = @transform_3, window_bounds = array<i64: 32, 8>}, {pipeline_mode = #tpu.pipeline_mode<synchronous>, transform_indices = @transform_4, window_bounds = array<i64: 32, 1>}, {pipeline_mode = #tpu.pipeline_mode<synchronous>, transform_indices = @transform_5, window_bounds = array<i64: 32, 128>}]} {
    %c0 = arith.constant 0 : index
    %c0_0 = arith.constant 0 : index
    %0 = vector.load %arg3[%c0, %c0_0] : memref<32x32xf32, #tpu.memory_space<vmem>>, vector<32x32xf32>
    %c0_1 = arith.constant 0 : index
    %c0_2 = arith.constant 0 : index
    %1 = vector.load %arg4[%c0_1, %c0_2] : memref<32x8xf32, #tpu.memory_space<vmem>>, vector<32x8xf32>
    %c0_3 = arith.constant 0 : index
    %c0_4 = arith.constant 0 : index
    %2 = vector.load %arg5[%c0_3, %c0_4] : memref<32x1xf32, #tpu.memory_space<vmem>>, vector<32x1xf32>
    %3 = vector.shape_cast %2 : vector<32x1xf32> to vector<32x1xf32>
    %4 = vector.broadcast %3 : vector<32x1xf32> to vector<32x128xf32>
    %c0_5 = arith.constant 0 : index
    %c0_6 = arith.constant 0 : index
    %5 = vector.load %arg1[%c0_5, %c0_6] : memref<32x128xf32, #tpu.memory_space<vmem>>, vector<32x128xf32>
    %cst = arith.constant 0.000000e+00 : f32
    %6 = vector.broadcast %cst : f32 to vector<32x128xf32>
    %c0_i32 = arith.constant 0 : i32
    %7 = arith.index_cast %c0_i32 : i32 to index
    %c0_7 = arith.constant 0 : index
    %c0_8 = arith.constant 0 : index
    %8 = vector.load %arg2[%7, %c0_7, %c0_8] : memref<8x8x128xf32, #tpu.memory_space<vmem>>, vector<1x8x128xf32>
    %9 = vector.shape_cast %8 : vector<1x8x128xf32> to vector<8x128xf32>
    %cst_9 = arith.constant dense<0.000000e+00> : vector<32x128xf32>
    %10 = tpu.matmul %1, %9, %cst_9 {dimension_numbers = #tpu.dot_dimension_numbers<[1], [0], [0], [1], [0, 0, 1, 1], [], []>} : vector<32x8xf32>, vector<8x128xf32>, vector<32x128xf32> -> vector<32x128xf32>
    %11 = arith.addf %10, %4 : vector<32x128xf32>
    %cst_10 = arith.constant dense<0.000000e+00> : vector<32x128xf32>
    %12 = tpu.matmul %0, %5, %cst_10 {dimension_numbers = #tpu.dot_dimension_numbers<[1], [0], [0], [1], [0, 0, 1, 1], [], []>} : vector<32x32xf32>, vector<32x128xf32>, vector<32x128xf32> -> vector<32x128xf32>
    %13 = arith.addf %12, %11 : vector<32x128xf32>
    %14 = math.tanh %13 : vector<32x128xf32>
    %15 = arith.addf %6, %14 : vector<32x128xf32>
    %c1_i32 = arith.constant 1 : i32
    %16 = arith.index_cast %c1_i32 : i32 to index
    %c0_11 = arith.constant 0 : index
    %c0_12 = arith.constant 0 : index
    %17 = vector.load %arg2[%16, %c0_11, %c0_12] : memref<8x8x128xf32, #tpu.memory_space<vmem>>, vector<1x8x128xf32>
    %18 = vector.shape_cast %17 : vector<1x8x128xf32> to vector<8x128xf32>
    %cst_13 = arith.constant dense<0.000000e+00> : vector<32x128xf32>
    %19 = tpu.matmul %1, %18, %cst_13 {dimension_numbers = #tpu.dot_dimension_numbers<[1], [0], [0], [1], [0, 0, 1, 1], [], []>} : vector<32x8xf32>, vector<8x128xf32>, vector<32x128xf32> -> vector<32x128xf32>
    %20 = arith.addf %19, %4 : vector<32x128xf32>
    %cst_14 = arith.constant dense<0.000000e+00> : vector<32x128xf32>
    %21 = tpu.matmul %0, %14, %cst_14 {dimension_numbers = #tpu.dot_dimension_numbers<[1], [0], [0], [1], [0, 0, 1, 1], [], []>} : vector<32x32xf32>, vector<32x128xf32>, vector<32x128xf32> -> vector<32x128xf32>
    %22 = arith.addf %21, %20 : vector<32x128xf32>
    %23 = math.tanh %22 : vector<32x128xf32>
    %24 = arith.addf %15, %23 : vector<32x128xf32>
    %c2_i32 = arith.constant 2 : i32
    %25 = arith.index_cast %c2_i32 : i32 to index
    %c0_15 = arith.constant 0 : index
    %c0_16 = arith.constant 0 : index
    %26 = vector.load %arg2[%25, %c0_15, %c0_16] : memref<8x8x128xf32, #tpu.memory_space<vmem>>, vector<1x8x128xf32>
    %27 = vector.shape_cast %26 : vector<1x8x128xf32> to vector<8x128xf32>
    %cst_17 = arith.constant dense<0.000000e+00> : vector<32x128xf32>
    %28 = tpu.matmul %1, %27, %cst_17 {dimension_numbers = #tpu.dot_dimension_numbers<[1], [0], [0], [1], [0, 0, 1, 1], [], []>} : vector<32x8xf32>, vector<8x128xf32>, vector<32x128xf32> -> vector<32x128xf32>
    %29 = arith.addf %28, %4 : vector<32x128xf32>
    %cst_18 = arith.constant dense<0.000000e+00> : vector<32x128xf32>
    %30 = tpu.matmul %0, %23, %cst_18 {dimension_numbers = #tpu.dot_dimension_numbers<[1], [0], [0], [1], [0, 0, 1, 1], [], []>} : vector<32x32xf32>, vector<32x128xf32>, vector<32x128xf32> -> vector<32x128xf32>
    %31 = arith.addf %30, %29 : vector<32x128xf32>
    %32 = math.tanh %31 : vector<32x128xf32>
    %33 = arith.addf %24, %32 : vector<32x128xf32>
    %c3_i32 = arith.constant 3 : i32
    %34 = arith.index_cast %c3_i32 : i32 to index
    %c0_19 = arith.constant 0 : index
    %c0_20 = arith.constant 0 : index
    %35 = vector.load %arg2[%34, %c0_19, %c0_20] : memref<8x8x128xf32, #tpu.memory_space<vmem>>, vector<1x8x128xf32>
    %36 = vector.shape_cast %35 : vector<1x8x128xf32> to vector<8x128xf32>
    %cst_21 = arith.constant dense<0.000000e+00> : vector<32x128xf32>
    %37 = tpu.matmul %1, %36, %cst_21 {dimension_numbers = #tpu.dot_dimension_numbers<[1], [0], [0], [1], [0, 0, 1, 1], [], []>} : vector<32x8xf32>, vector<8x128xf32>, vector<32x128xf32> -> vector<32x128xf32>
    %38 = arith.addf %37, %4 : vector<32x128xf32>
    %cst_22 = arith.constant dense<0.000000e+00> : vector<32x128xf32>
    %39 = tpu.matmul %0, %32, %cst_22 {dimension_numbers = #tpu.dot_dimension_numbers<[1], [0], [0], [1], [0, 0, 1, 1], [], []>} : vector<32x32xf32>, vector<32x128xf32>, vector<32x128xf32> -> vector<32x128xf32>
    %40 = arith.addf %39, %38 : vector<32x128xf32>
    %41 = math.tanh %40 : vector<32x128xf32>
    %42 = arith.addf %33, %41 : vector<32x128xf32>
    %c4_i32 = arith.constant 4 : i32
    %43 = arith.index_cast %c4_i32 : i32 to index
    %c0_23 = arith.constant 0 : index
    %c0_24 = arith.constant 0 : index
    %44 = vector.load %arg2[%43, %c0_23, %c0_24] : memref<8x8x128xf32, #tpu.memory_space<vmem>>, vector<1x8x128xf32>
    %45 = vector.shape_cast %44 : vector<1x8x128xf32> to vector<8x128xf32>
    %cst_25 = arith.constant dense<0.000000e+00> : vector<32x128xf32>
    %46 = tpu.matmul %1, %45, %cst_25 {dimension_numbers = #tpu.dot_dimension_numbers<[1], [0], [0], [1], [0, 0, 1, 1], [], []>} : vector<32x8xf32>, vector<8x128xf32>, vector<32x128xf32> -> vector<32x128xf32>
    %47 = arith.addf %46, %4 : vector<32x128xf32>
    %cst_26 = arith.constant dense<0.000000e+00> : vector<32x128xf32>
    %48 = tpu.matmul %0, %41, %cst_26 {dimension_numbers = #tpu.dot_dimension_numbers<[1], [0], [0], [1], [0, 0, 1, 1], [], []>} : vector<32x32xf32>, vector<32x128xf32>, vector<32x128xf32> -> vector<32x128xf32>
    %49 = arith.addf %48, %47 : vector<32x128xf32>
    %50 = math.tanh %49 : vector<32x128xf32>
    %51 = arith.addf %42, %50 : vector<32x128xf32>
    %c5_i32 = arith.constant 5 : i32
    %52 = arith.index_cast %c5_i32 : i32 to index
    %c0_27 = arith.constant 0 : index
    %c0_28 = arith.constant 0 : index
    %53 = vector.load %arg2[%52, %c0_27, %c0_28] : memref<8x8x128xf32, #tpu.memory_space<vmem>>, vector<1x8x128xf32>
    %54 = vector.shape_cast %53 : vector<1x8x128xf32> to vector<8x128xf32>
    %cst_29 = arith.constant dense<0.000000e+00> : vector<32x128xf32>
    %55 = tpu.matmul %1, %54, %cst_29 {dimension_numbers = #tpu.dot_dimension_numbers<[1], [0], [0], [1], [0, 0, 1, 1], [], []>} : vector<32x8xf32>, vector<8x128xf32>, vector<32x128xf32> -> vector<32x128xf32>
    %56 = arith.addf %55, %4 : vector<32x128xf32>
    %cst_30 = arith.constant dense<0.000000e+00> : vector<32x128xf32>
    %57 = tpu.matmul %0, %50, %cst_30 {dimension_numbers = #tpu.dot_dimension_numbers<[1], [0], [0], [1], [0, 0, 1, 1], [], []>} : vector<32x32xf32>, vector<32x128xf32>, vector<32x128xf32> -> vector<32x128xf32>
    %58 = arith.addf %57, %56 : vector<32x128xf32>
    %59 = math.tanh %58 : vector<32x128xf32>
    %60 = arith.addf %51, %59 : vector<32x128xf32>
    %c6_i32 = arith.constant 6 : i32
    %61 = arith.index_cast %c6_i32 : i32 to index
    %c0_31 = arith.constant 0 : index
    %c0_32 = arith.constant 0 : index
    %62 = vector.load %arg2[%61, %c0_31, %c0_32] : memref<8x8x128xf32, #tpu.memory_space<vmem>>, vector<1x8x128xf32>
    %63 = vector.shape_cast %62 : vector<1x8x128xf32> to vector<8x128xf32>
    %cst_33 = arith.constant dense<0.000000e+00> : vector<32x128xf32>
    %64 = tpu.matmul %1, %63, %cst_33 {dimension_numbers = #tpu.dot_dimension_numbers<[1], [0], [0], [1], [0, 0, 1, 1], [], []>} : vector<32x8xf32>, vector<8x128xf32>, vector<32x128xf32> -> vector<32x128xf32>
    %65 = arith.addf %64, %4 : vector<32x128xf32>
    %cst_34 = arith.constant dense<0.000000e+00> : vector<32x128xf32>
    %66 = tpu.matmul %0, %59, %cst_34 {dimension_numbers = #tpu.dot_dimension_numbers<[1], [0], [0], [1], [0, 0, 1, 1], [], []>} : vector<32x32xf32>, vector<32x128xf32>, vector<32x128xf32> -> vector<32x128xf32>
    %67 = arith.addf %66, %65 : vector<32x128xf32>
    %68 = math.tanh %67 : vector<32x128xf32>
    %69 = arith.addf %60, %68 : vector<32x128xf32>
    %c7_i32 = arith.constant 7 : i32
    %70 = arith.index_cast %c7_i32 : i32 to index
    %c0_35 = arith.constant 0 : index
    %c0_36 = arith.constant 0 : index
    %71 = vector.load %arg2[%70, %c0_35, %c0_36] : memref<8x8x128xf32, #tpu.memory_space<vmem>>, vector<1x8x128xf32>
    %72 = vector.shape_cast %71 : vector<1x8x128xf32> to vector<8x128xf32>
    %cst_37 = arith.constant dense<0.000000e+00> : vector<32x128xf32>
    %73 = tpu.matmul %1, %72, %cst_37 {dimension_numbers = #tpu.dot_dimension_numbers<[1], [0], [0], [1], [0, 0, 1, 1], [], []>} : vector<32x8xf32>, vector<8x128xf32>, vector<32x128xf32> -> vector<32x128xf32>
    %74 = arith.addf %73, %4 : vector<32x128xf32>
    %cst_38 = arith.constant dense<0.000000e+00> : vector<32x128xf32>
    %75 = tpu.matmul %0, %68, %cst_38 {dimension_numbers = #tpu.dot_dimension_numbers<[1], [0], [0], [1], [0, 0, 1, 1], [], []>} : vector<32x32xf32>, vector<32x128xf32>, vector<32x128xf32> -> vector<32x128xf32>
    %76 = arith.addf %75, %74 : vector<32x128xf32>
    %77 = math.tanh %76 : vector<32x128xf32>
    %78 = arith.addf %69, %77 : vector<32x128xf32>
    %c8_i32 = arith.constant 8 : i32
    %c0_39 = arith.constant 0 : index
    %c0_40 = arith.constant 0 : index
    %79 = vector.load %arg6[%c0_39, %c0_40] : memref<32x128xf32, #tpu.memory_space<vmem>>, vector<32x128xf32>
    tpu.vector_store %arg6[%c0_39, %c0_40], %78 {strides = array<i32>} : memref<32x128xf32, #tpu.memory_space<vmem>>, vector<32x128xf32>,
    return
  }
  func.func @transform_0(%arg0: i32) -> (i32, i32) {
    %c0_i32 = arith.constant 0 : i32
    %c0_i32_0 = arith.constant 0 : i32
    %c0_i32_1 = arith.constant 0 : i32
    return %c0_i32, %c0_i32_0 : i32, i32
  }
  func.func @transform_1(%arg0: i32) -> (i32, i32, i32) {
    %c0_i32 = arith.constant 0 : i32
    %c0_i32_0 = arith.constant 0 : i32
    %c0_i32_1 = arith.constant 0 : i32
    %c0_i32_2 = arith.constant 0 : i32
    return %c0_i32, %c0_i32_0, %c0_i32_1 : i32, i32, i32
  }
  func.func @transform_2(%arg0: i32) -> (i32, i32) {
    %c0_i32 = arith.constant 0 : i32
    %c0_i32_0 = arith.constant 0 : i32
    %c0_i32_1 = arith.constant 0 : i32
    return %c0_i32, %c0_i32_0 : i32, i32
  }
  func.func @transform_3(%arg0: i32) -> (i32, i32) {
    %c0_i32 = arith.constant 0 : i32
    %c0_i32_0 = arith.constant 0 : i32
    %c0_i32_1 = arith.constant 0 : i32
    return %c0_i32, %c0_i32_0 : i32, i32
  }
  func.func @transform_4(%arg0: i32) -> (i32, i32) {
    %c0_i32 = arith.constant 0 : i32
    %c0_i32_0 = arith.constant 0 : i32
    %c0_i32_1 = arith.constant 0 : i32
    return %c0_i32, %c0_i32_0 : i32, i32
  }
  func.func @transform_5(%arg0: i32) -> (i32, i32) {
    %c0_i32 = arith.constant 0 : i32
    %c0_i32_0 = arith.constant 0 : i32
    %c0_i32_1 = arith.constant 0 : i32
    return %c0_i32, %c0_i32_0 : i32, i32
  }
}

</mosaic_0001>

<bundles_post_ra>
// kernel: tpu_custom_call.1
= control target key start
LH: loop header
LB: loop body
LE: loop exit
PB: predicated region body
PF: predicated region fallthrough
CT: control target
= control target key end

     0   :  { %10 = vsyncpa [#allocation3], 0  ;;  %s2524_s0 = inlined_call_operand.hbm [shape: f32[32,128], index: 0, kind: input, shape index: {}]   ;;  %s2525_s1 = inlined_call_operand.vmem [shape: f32[8,8,128], index: 1, kind: input, shape index: {}]   ;;  %s2526_s2 = inlined_call_operand.hbm [shape: f32[32,32], index: 2, kind: input, shape index: {}]   ;;  %s2527_s3 = inlined_call_operand.vmem [shape: f32[32,8], index: 3, kind: input, shape index: {}]   ;;  %s2528_s4 = inlined_call_operand.vmem [shape: f32[32,1], index: 4, kind: input, shape index: {}]   ;;  %s2529_s5 = inlined_call_operand.hbm [shape: f32[32,128], index: 5, kind: output, shape index: {}]  }
   0x1   :  { %11 = vsyncpa [#allocation6], 0 }
   0x2   :  { %12 = vsyncpa [#allocation4], 0  ;;  %s2195_s18 = smov [#allocation2]   ;;  %s2123_s22 = scalar_lea.hbm %s2524_s0, 512 }
   0x3   :  { %s18_s19 = sshll.u32 %s2195_s18, 4  ;;  %p2124_p0 = scmp.ne.s32.totalorder %s2524_s0, %s2123_s22  ;;  %s19_s19 = int_to_ptr.vmem [resolvable:$true] %s18_s19 }
   0x4   :  { %p2127_p1 = scmp.lt.u32.totalorder %s2123_s22, %s2524_s0 }
   0x6   :  { %p2129_p2 = pnand %p2127_p1, %p2124_p0 }
   0x8   :  { %2132 = shalt.err (!%p2129_p2)
}
   0x9   :  { %s2133_s27 = scalar_lea.vmem %s19_s19, 512  ;;  %p2138_p4 = scmp.lt.s32.totalorder %s19_s19, %s19_s19 }
   0xa   :  { %p2134_p3 = scmp.ne.s32.totalorder %s19_s19, %s2133_s27  ;;  %p2139_p5 = scmp.lt.s32.totalorder %s2133_s27, %s2133_s27 }
   0xc   :  { %p2140_p6 = por %p2139_p5, %p2138_p4 }
   0xe   :  { %p2141_p7 = pnand %p2140_p6, %p2134_p3 }
  0x10   :  { %2144 = shalt.err (!%p2141_p7)
}
  0x11   :  { %s2196_s28 = smov 128   ;;  %s2197_s29 = smov 8  }
  0x12   :  { %24 = dma.hbm_to_vmem [thread:$0]  %s2524_s0, 512, %s19_s19, [#allocation3], %s2196_s28, %s2196_s28, %s2197_s29  }
  0x13   :  { %s2198_s7 = smov [#allocation5]   ;;  %s2145_s11 = scalar_lea.hbm %s2526_s2, 512 }
  0x14   :  { %s32_s8 = sshll.u32 %s2198_s7, 4  ;;  %p2146_p8 = scmp.ne.s32.totalorder %s2526_s2, %s2145_s11  ;;  %s33_s8 = int_to_ptr.vmem [resolvable:$true] %s32_s8 }
  0x15   :  { %p2149_p9 = scmp.lt.u32.totalorder %s2145_s11, %s2526_s2 }
  0x17   :  { %p2151_p10 = pnand %p2149_p9, %p2146_p8 }
  0x19   :  { %2154 = shalt.err (!%p2151_p10)
}
  0x1a   :  { %s2155_s16 = scalar_lea.vmem %s33_s8, 512  ;;  %p2160_p12 = scmp.lt.s32.totalorder %s33_s8, %s33_s8 }
  0x1b   :  { %p2156_p11 = scmp.ne.s32.totalorder %s33_s8, %s2155_s16  ;;  %p2161_p13 = scmp.lt.s32.totalorder %s2155_s16, %s2155_s16 }
  0x1d   :  { %p2162_p0 = por %p2161_p13, %p2160_p12 }
  0x1f   :  { %p2163_p1 = pnand %p2162_p0, %p2156_p11 }
  0x21   :  { %2166 = shalt.err (!%p2163_p1)
}
  0x22   :  { %38 = dma.hbm_to_vmem [thread:$0]  %s2526_s2, 512, %s33_s8, [#allocation6], %s2196_s28, %s2196_s28, %s2197_s29  }
  0x23   :  { %2189 = dma.done.wait [#allocation3], 512  }
  0x24   :  { %2190 = vsyncadd [#allocation3], 4294966784 }
  0x25   :  { %2191 = dma.done.wait [#allocation6], 512  }
  0x26   :  { %2192 = vsyncadd [#allocation6], 4294966784  ;;  %v2199_v0 = vmov 0   ;;  %vm86_vm0 = vcmask 64512   ;;  %v85_v1 = vld [vmem:[%s2525_s1] sm:$0xff]  ;;  %v2272_v3 = vld [vmem:[%s2527_s3 + $0x8] sm:$0xff] }
  0x27   :  { %2057 = vset.pattern.permute.xlu0 %v2199_v0  ;;  %2058 = vset.pattern.permute.xlu1 %v2199_v0  ;;  %v2267_v2 = vld [vmem:[%s2527_s3] sm:$0xff]  ;;  %v82_v5 = vld [vmem:[#allocation2 + $0x8] sm:$0xff]  ;;  %v2279_v6 = vld [vmem:[%s2527_s3 + $0x10] sm:$0xff]  ;;  %vm184_vm1 = vcmask 261120  }
  0x28   :  { %1747 = vmatprep.subr.mxu0 %v85_v1  ;;  %1749 = vmatprep.mubr.msk.f32.mxu0 %vm86_vm0, %v2267_v2  ;;  %v81_v4 = vld [vmem:[#allocation2] sm:$0xff]  ;;  %v83_v8 = vld [vmem:[#allocation2 + $0x10] sm:$0xff]  ;;  %v84_v9 = vld [vmem:[#allocation2 + $0x18] sm:$0xff] }
  0x29   :  { %1748 = vmatpush3.msra.mxu0 %v85_v1  ;;  %v1923_v7 = vpack.c.bf16 %v82_v5, %v81_v4  ;;  %1771 = vmatprep.mubr.msk.f32.mxu1 %vm86_vm0, %v2267_v2  ;;  %v1927_v10 = vpack.c.bf16 %v84_v9, %v83_v8  ;;  %v2290_v11 = vld [vmem:[%s2527_s3 + $0x18] sm:$0xff]  ;;  %v57_v12 = vld [vmem:[%s2528_s4] sm:$0xff]  ;;  %v59_v13 = vld [vmem:[%s2528_s4 + $0x10] sm:$0xff] }
  0x2a   :  { %1750 = vmatmul.mubr.msk.f32.vlgmr.msra.gmra.mrb[0].mxu0 %vm86_vm0, %v2272_v3  ;;  %v2298_v14 = vld [vmem:[#allocation5] sm:$0xff]  ;;  %63 = vperm.xlu0 %2057, %v57_v12   ;;  %v58_v15 = vld [vmem:[%s2528_s4 + $0x8] sm:$0xff]  ;;  %v60_v16 = vld [vmem:[%s2528_s4 + $0x18] sm:$0xff] }
  0x2b   :  { %1924 = vmatprep.subr.bf16.mxu0 %v1923_v7  ;;  %1752 = vmatprep.mubr.msk.f32.mxu0 %vm86_vm0, %v2279_v6  ;;  %v2310_v17 = vld [vmem:[#allocation5 + $0x8] sm:$0xff]  ;;  %v2312_v18 = vld [vmem:[#allocation5 + $0x10] sm:$0xff]  ;;  %v2318_v19 = vld [vmem:[#allocation5 + $0x18] sm:$0xff] }
  0x2c   :  { %1926 = vmatpush3.bf16.msra.mxu0 %v1923_v7  ;;  %73 = vperm.xlu1 %2058, %v59_v13   ;;  %v1580_v20 = vld [vmem:[%s2525_s1 + $0x8] sm:$0xff]  ;;  %v1589_v39 = vld [vmem:[%s2525_s1 + $0x10] sm:$0xff]  ;;  %v1598_v54 = vld [vmem:[%s2525_s1 + $0x18] sm:$0xff] }
  0x2d   :  { %1928 = vmatprep.subr.bf16.mxu0 %v1927_v10  ;;  %1769 = vmatprep.subr.mxu1 %v1580_v20 }
  0x2e   :  { %1753 = vmatmul.mubr.msk.f32.gmra.mrb[2].mxu0 %vm86_vm0, %v2290_v11  ;;  %68 = vperm.xlu0 %2057, %v58_v15  }
  0x2f   :  { %1763 = vmatprep.mubr.msk.f32.mxu0 %vm184_vm1, %v2298_v14  ;;  %1770 = vmatpush3.msra.mxu1 %v1580_v20 }
  0x30   :  { %1930 = vmatpush3.bf16.msra.mxu0 %v1927_v10  ;;  %78 = vperm.xlu1 %2058, %v60_v16  }
  0x31   :  { %1772 = vmatmul.mubr.msk.f32.vlgmr.msra.gmra.mrb[0].mxu1 %vm86_vm0, %v2272_v3  ;;  %1791 = vmatprep.subr.mxu0 %v1589_v39 }
  0x32   :  { %1774 = vmatprep.mubr.msk.f32.mxu1 %vm86_vm0, %v2279_v6 }
  0x33   :  { %1764 = vmatmul.mubr.msk.f32.vlgmr.msra.gmra.mrb[0].mxu0 %vm184_vm1, %v2310_v17 }
  0x34   :  { %1766 = vmatprep.mubr.msk.f32.mxu0 %vm184_vm1, %v2312_v18  ;;  %1792 = vmatpush3.msra.mxu0 %v1589_v39 }
  0x35   :  { %1775 = vmatmul.mubr.msk.f32.gmra.mrb[2].mxu1 %vm86_vm0, %v2290_v11 }
  0x36   :  { %1785 = vmatprep.mubr.msk.f32.mxu1 %vm184_vm1, %v2298_v14 }
  0x37   :  { %1767 = vmatmul.mubr.msk.f32.gmra.mrb[2].mxu0 %vm184_vm1, %v2318_v19 }
  0x38   :  { %1793 = vmatprep.mubr.msk.f32.mxu0 %vm86_vm0, %v2267_v2 }
  0x3b   :  { %1794 = vmatmul.mubr.msk.f32.vlgmr.msra.gmra.mrb[4].mxu0 %vm86_vm0, %v2272_v3 }
  0x3c   :  { %1796 = vmatprep.mubr.msk.f32.mxu0 %vm86_vm0, %v2279_v6 }
  0x3f   :  { %1797 = vmatmul.mubr.msk.f32.gmra.mrb[6].mxu0 %vm86_vm0, %v2290_v11 }
  0x40   :  { %1807 = vmatprep.mubr.msk.f32.mxu0 %vm184_vm1, %v2298_v14 }
  0xa9   :  { %v2335_v21 = vpop.permute.xlu0 %63 }
  0xab   :  { %v2337_v22 = vpop.permute.xlu1 %73 }
  0xad   :  { %v2339_v23 = vpop.permute.xlu0 %68 }
  0xaf   :  { %v2343_v28 = vpop.permute.xlu1 %78 }
 0x106   :  { %v1765_v24 = vpop.f32.mrb[0].mxu0 }
 0x107   :  { %v1987_v25 = vadd.f32 %v1765_v24, %v2339_v23  ;;  %v263_v26 = vpop.f32.mrb[1].mxu0  ;;  %v1607_v24 = vld [vmem:[%s2525_s1 + $0x20] sm:$0xff] }
 0x108   :  { %v1988_v27 = vadd.f32 %v263_v26, %v2335_v21 }
 0x109   :  { %2059 = vtanh.f32 %v1987_v25 }
 0x10a   :  { %2061 = vtanh.f32 %v1988_v27  ;;  %v1768_v29 = vpop.f32.mrb[2].mxu0 }
 0x10b   :  { %v1989_v30 = vadd.f32 %v1768_v29, %v2343_v28  ;;  %v273_v31 = vpop.f32.mrb[3].mxu0 }
 0x10c   :  { %v1990_v32 = vadd.f32 %v273_v31, %v2337_v22 }
 0x10d   :  { %2063 = vtanh.f32 %v1989_v30 }
 0x10e   :  { %2065 = vtanh.f32 %v1990_v32 }
 0x113   :  { %v2347_v33 = vpop.eup %2059 }
 0x114   :  { %v2349_v34 = vpop.eup %2061 }
 0x115   :  { %v1931_v35 = vpack.c.bf16 %v2347_v33, %v2349_v34 }
 0x117   :  { %v2353_v36 = vpop.eup %2063  ;;  %1932 = vmatprep.subr.bf16.mxu1 %v1931_v35 }
 0x118   :  { %v2355_v37 = vpop.eup %2065  ;;  %1934 = vmatpush3.bf16.msra.mxu1 %v1931_v35 }
 0x119   :  { %v1935_v38 = vpack.c.bf16 %v2353_v36, %v2355_v37 }
 0x11b   :  { %1936 = vmatprep.subr.bf16.mxu1 %v1935_v38 }
 0x11c   :  { %1938 = vmatpush3.bf16.msra.mxu1 %v1935_v38 }
 0x11d   :  { %1813 = vmatprep.subr.mxu1 %v1598_v54 }
 0x11f   :  { %1786 = vmatmul.mubr.msk.f32.vlgmr.msra.gmra.mrb[0].mxu1 %vm184_vm1, %v2310_v17 }
 0x120   :  { %1788 = vmatprep.mubr.msk.f32.mxu1 %vm184_vm1, %v2312_v18  ;;  %1814 = vmatpush3.msra.mxu1 %v1598_v54 }
 0x123   :  { %1789 = vmatmul.mubr.msk.f32.gmra.mrb[2].mxu1 %vm184_vm1, %v2318_v19 }
 0x124   :  { %1815 = vmatprep.mubr.msk.f32.mxu1 %vm86_vm0, %v2267_v2 }
 0x127   :  { %1816 = vmatmul.mubr.msk.f32.vlgmr.msra.gmra.mrb[4].mxu1 %vm86_vm0, %v2272_v3 }
 0x128   :  { %1818 = vmatprep.mubr.msk.f32.mxu1 %vm86_vm0, %v2279_v6 }
 0x12b   :  { %1819 = vmatmul.mubr.msk.f32.gmra.mrb[6].mxu1 %vm86_vm0, %v2290_v11 }
 0x12c   :  { %1829 = vmatprep.mubr.msk.f32.mxu1 %vm184_vm1, %v2298_v14 }
 0x1f2   :  { %v1787_v40 = vpop.f32.mrb[0].mxu1 }
 0x1f3   :  { %v1991_v41 = vadd.f32 %v1787_v40, %v2339_v23  ;;  %v443_v42 = vpop.f32.mrb[1].mxu1 }
 0x1f4   :  { %v1992_v43 = vadd.f32 %v443_v42, %v2335_v21 }
 0x1f5   :  { %2067 = vtanh.f32 %v1991_v41 }
 0x1f6   :  { %2069 = vtanh.f32 %v1992_v43  ;;  %v1790_v44 = vpop.f32.mrb[2].mxu1 }
 0x1f7   :  { %v1993_v45 = vadd.f32 %v1790_v44, %v2343_v28  ;;  %v453_v46 = vpop.f32.mrb[3].mxu1  ;;  %v1616_v44 = vld [vmem:[%s2525_s1 + $0x28] sm:$0xff] }
 0x1f8   :  { %v1994_v47 = vadd.f32 %v453_v46, %v2337_v22 }
 0x1f9   :  { %2071 = vtanh.f32 %v1993_v45 }
 0x1fa   :  { %2073 = vtanh.f32 %v1994_v47 }
 0x1ff   :  { %v2068_v48 = vpop.eup %2067 }
 0x200   :  { %v2070_v49 = vpop.eup %2069  ;;  %v467_v63 = vadd.f32 %v2068_v48, %v2347_v33 }
 0x201   :  { %v1939_v50 = vpack.c.bf16 %v2068_v48, %v2070_v49  ;;  %v466_v1 = vadd.f32 %v2070_v49, %v2349_v34 }
 0x203   :  { %v2072_v51 = vpop.eup %2071  ;;  %1940 = vmatprep.subr.bf16.mxu0 %v1939_v50 }
 0x204   :  { %v2074_v52 = vpop.eup %2073  ;;  %1942 = vmatpush3.bf16.msra.mxu0 %v1939_v50  ;;  %v469_v9 = vadd.f32 %v2072_v51, %v2353_v36 }
 0x205   :  { %v1943_v53 = vpack.c.bf16 %v2072_v51, %v2074_v52  ;;  %v468_v12 = vadd.f32 %v2074_v52, %v2355_v37 }
 0x207   :  { %1944 = vmatprep.subr.bf16.mxu0 %v1943_v53 }
 0x208   :  { %1946 = vmatpush3.bf16.msra.mxu0 %v1943_v53 }
 0x209   :  { %1835 = vmatprep.subr.mxu0 %v1607_v24 }
 0x20b   :  { %1808 = vmatmul.mubr.msk.f32.vlgmr.msra.gmra.mrb[4].mxu0 %vm184_vm1, %v2310_v17 }
 0x20c   :  { %1810 = vmatprep.mubr.msk.f32.mxu0 %vm184_vm1, %v2312_v18  ;;  %1836 = vmatpush3.msra.mxu0 %v1607_v24 }
 0x20f   :  { %1811 = vmatmul.mubr.msk.f32.gmra.mrb[6].mxu0 %vm184_vm1, %v2318_v19 }
 0x210   :  { %1837 = vmatprep.mubr.msk.f32.mxu0 %vm86_vm0, %v2267_v2 }
 0x213   :  { %1838 = vmatmul.mubr.msk.f32.vlgmr.msra.gmra.mrb[8].mxu0 %vm86_vm0, %v2272_v3 }
 0x214   :  { %1840 = vmatprep.mubr.msk.f32.mxu0 %vm86_vm0, %v2279_v6 }
 0x217   :  { %1841 = vmatmul.mubr.msk.f32.gmra.mrb[10].mxu0 %vm86_vm0, %v2290_v11 }
 0x218   :  { %1851 = vmatprep.mubr.msk.f32.mxu0 %vm184_vm1, %v2298_v14 }
 0x2de   :  { %v1809_v55 = vpop.f32.mrb[4].mxu0 }
 0x2df   :  { %v1995_v56 = vadd.f32 %v1809_v55, %v2339_v23  ;;  %v623_v57 = vpop.f32.mrb[5].mxu0 }
 0x2e0   :  { %v1996_v58 = vadd.f32 %v623_v57, %v2335_v21 }
 0x2e1   :  { %2075 = vtanh.f32 %v1995_v56 }
 0x2e2   :  { %2077 = vtanh.f32 %v1996_v58  ;;  %v1812_v59 = vpop.f32.mrb[6].mxu0 }
 0x2e3   :  { %v1997_v60 = vadd.f32 %v1812_v59, %v2343_v28  ;;  %v633_v61 = vpop.f32.mrb[7].mxu0 }
 0x2e4   :  { %v1998_v62 = vadd.f32 %v633_v61, %v2337_v22 }
 0x2e5   :  { %2079 = vtanh.f32 %v1997_v60 }
 0x2e6   :  { %2081 = vtanh.f32 %v1998_v62 }
 0x2eb   :  { %v2076_v0 = vpop.eup %2075 }
 0x2ec   :  { %v2078_v4 = vpop.eup %2077  ;;  %v647_v5 = vadd.f32 %v2076_v0, %v467_v63  ;;  %v1625_v63 = vld [vmem:[%s2525_s1 + $0x30] sm:$0xff] }
 0x2ed   :  { %v646_v7 = vadd.f32 %v2078_v4, %v466_v1  ;;  %v1947_v8 = vpack.c.bf16 %v2076_v0, %v2078_v4 }
 0x2ef   :  { %v2080_v10 = vpop.eup %2079  ;;  %1948 = vmatprep.subr.bf16.mxu1 %v1947_v8 }
 0x2f0   :  { %v2082_v13 = vpop.eup %2081  ;;  %v649_v15 = vadd.f32 %v2080_v10, %v469_v9  ;;  %1950 = vmatpush3.bf16.msra.mxu1 %v1947_v8 }
 0x2f1   :  { %v648_v16 = vadd.f32 %v2082_v13, %v468_v12  ;;  %v1951_v20 = vpack.c.bf16 %v2080_v10, %v2082_v13 }
 0x2f3   :  { %1952 = vmatprep.subr.bf16.mxu1 %v1951_v20 }
 0x2f4   :  { %1954 = vmatpush3.bf16.msra.mxu1 %v1951_v20 }
 0x2f5   :  { %1857 = vmatprep.subr.mxu1 %v1616_v44 }
 0x2f7   :  { %1830 = vmatmul.mubr.msk.f32.vlgmr.msra.gmra.mrb[4].mxu1 %vm184_vm1, %v2310_v17 }
 0x2f8   :  { %1832 = vmatprep.mubr.msk.f32.mxu1 %vm184_vm1, %v2312_v18  ;;  %1858 = vmatpush3.msra.mxu1 %v1616_v44 }
 0x2fb   :  { %1833 = vmatmul.mubr.msk.f32.gmra.mrb[6].mxu1 %vm184_vm1, %v2318_v19 }
 0x2fc   :  { %1859 = vmatprep.mubr.msk.f32.mxu1 %vm86_vm0, %v2267_v2 }
 0x2ff   :  { %1860 = vmatmul.mubr.msk.f32.vlgmr.msra.gmra.mrb[8].mxu1 %vm86_vm0, %v2272_v3 }
 0x300   :  { %1862 = vmatprep.mubr.msk.f32.mxu1 %vm86_vm0, %v2279_v6 }
 0x303   :  { %1863 = vmatmul.mubr.msk.f32.gmra.mrb[10].mxu1 %vm86_vm0, %v2290_v11 }
 0x304   :  { %1873 = vmatprep.mubr.msk.f32.mxu1 %vm184_vm1, %v2298_v14 }
 0x3ca   :  { %v1831_v25 = vpop.f32.mrb[4].mxu1 }
 0x3cb   :  { %v1999_v26 = vadd.f32 %v1831_v25, %v2339_v23  ;;  %v803_v27 = vpop.f32.mrb[5].mxu1 }
 0x3cc   :  { %v2000_v29 = vadd.f32 %v803_v27, %v2335_v21 }
 0x3cd   :  { %2083 = vtanh.f32 %v1999_v26 }
 0x3ce   :  { %2085 = vtanh.f32 %v2000_v29  ;;  %v1834_v30 = vpop.f32.mrb[6].mxu1  ;;  %v1634_v29 = vld [vmem:[%s2525_s1 + $0x38] sm:$0xff]  ;;  %s2200_s1 = smov [#allocation7]  }
 0x3cf   :  { %v2001_v31 = vadd.f32 %v1834_v30, %v2343_v28  ;;  %v813_v32 = vpop.f32.mrb[7].mxu1  ;;  %s1559_s23 = sshll.u32 %s2200_s1, 4  ;;  %s1560_s23 = int_to_ptr.vmem [resolvable:$true] %s1559_s23 }
 0x3d0   :  { %v2002_v33 = vadd.f32 %v813_v32, %v2337_v22  ;;  %s2167_s2 = scalar_lea.vmem %s1560_s23, 512  ;;  %p2172_p3 = scmp.lt.s32.totalorder %s1560_s23, %s1560_s23 }
 0x3d1   :  { %2087 = vtanh.f32 %v2001_v31  ;;  %p2168_p2 = scmp.ne.s32.totalorder %s1560_s23, %s2167_s2  ;;  %p2173_p4 = scmp.lt.s32.totalorder %s2167_s2, %s2167_s2 }
 0x3d2   :  { %2089 = vtanh.f32 %v2002_v33 }
 0x3d3   :  { %p2174_p5 = por %p2173_p4, %p2172_p3 }
 0x3d5   :  { %p2175_p6 = pnand %p2174_p5, %p2168_p2 }
 0x3d7   :  { %v2084_v34 = vpop.eup %2083 }
 0x3d8   :  { %v2086_v35 = vpop.eup %2085  ;;  %v827_v36 = vadd.f32 %v2084_v34, %v647_v5 }
 0x3d9   :  { %v826_v37 = vadd.f32 %v2086_v35, %v646_v7  ;;  %v1955_v38 = vpack.c.bf16 %v2084_v34, %v2086_v35 }
 0x3db   :  { %v2088_v39 = vpop.eup %2087  ;;  %1956 = vmatprep.subr.bf16.mxu0 %v1955_v38 }
 0x3dc   :  { %v2090_v40 = vpop.eup %2089  ;;  %v829_v41 = vadd.f32 %v2088_v39, %v649_v15  ;;  %1958 = vmatpush3.bf16.msra.mxu0 %v1955_v38 }
 0x3dd   :  { %v828_v42 = vadd.f32 %v2090_v40, %v648_v16  ;;  %v1959_v43 = vpack.c.bf16 %v2088_v39, %v2090_v40 }
 0x3df   :  { %1960 = vmatprep.subr.bf16.mxu0 %v1959_v43 }
 0x3e0   :  { %1962 = vmatpush3.bf16.msra.mxu0 %v1959_v43 }
 0x3e1   :  { %1879 = vmatprep.subr.mxu0 %v1625_v63 }
 0x3e3   :  { %1852 = vmatmul.mubr.msk.f32.vlgmr.msra.gmra.mrb[8].mxu0 %vm184_vm1, %v2310_v17 }
 0x3e4   :  { %1854 = vmatprep.mubr.msk.f32.mxu0 %vm184_vm1, %v2312_v18  ;;  %1880 = vmatpush3.msra.mxu0 %v1625_v63 }
 0x3e7   :  { %1855 = vmatmul.mubr.msk.f32.gmra.mrb[10].mxu0 %vm184_vm1, %v2318_v19 }
 0x3e8   :  { %1881 = vmatprep.mubr.msk.f32.mxu0 %vm86_vm0, %v2267_v2 }
 0x3eb   :  { %1882 = vmatmul.mubr.msk.f32.vlgmr.msra.gmra.mrb[12].mxu0 %vm86_vm0, %v2272_v3 }
 0x3ec   :  { %1884 = vmatprep.mubr.msk.f32.mxu0 %vm86_vm0, %v2279_v6 }
 0x3ef   :  { %1885 = vmatmul.mubr.msk.f32.gmra.mrb[14].mxu0 %vm86_vm0, %v2290_v11 }
 0x3f0   :  { %1895 = vmatprep.mubr.msk.f32.mxu0 %vm184_vm1, %v2298_v14 }
 0x4b6   :  { %v1853_v45 = vpop.f32.mrb[8].mxu0 }
 0x4b7   :  { %v2003_v46 = vadd.f32 %v1853_v45, %v2339_v23  ;;  %v983_v47 = vpop.f32.mrb[9].mxu0 }
 0x4b8   :  { %v2004_v48 = vadd.f32 %v983_v47, %v2335_v21 }
 0x4b9   :  { %2091 = vtanh.f32 %v2003_v46 }
 0x4ba   :  { %2093 = vtanh.f32 %v2004_v48  ;;  %v1856_v49 = vpop.f32.mrb[10].mxu0 }
 0x4bb   :  { %v2005_v50 = vadd.f32 %v1856_v49, %v2343_v28  ;;  %v993_v51 = vpop.f32.mrb[11].mxu0 }
 0x4bc   :  { %v2006_v52 = vadd.f32 %v993_v51, %v2337_v22 }
 0x4bd   :  { %2095 = vtanh.f32 %v2005_v50 }
 0x4be   :  { %2097 = vtanh.f32 %v2006_v52 }
 0x4c3   :  { %v2092_v53 = vpop.eup %2091 }
 0x4c4   :  { %v2094_v54 = vpop.eup %2093  ;;  %v1007_v55 = vadd.f32 %v2092_v53, %v827_v36 }
 0x4c5   :  { %v1006_v56 = vadd.f32 %v2094_v54, %v826_v37  ;;  %v1963_v57 = vpack.c.bf16 %v2092_v53, %v2094_v54 }
 0x4c7   :  { %v2096_v58 = vpop.eup %2095  ;;  %1964 = vmatprep.subr.bf16.mxu1 %v1963_v57 }
 0x4c8   :  { %v2098_v59 = vpop.eup %2097  ;;  %v1009_v60 = vadd.f32 %v2096_v58, %v829_v41  ;;  %1966 = vmatpush3.bf16.msra.mxu1 %v1963_v57 }
 0x4c9   :  { %v1008_v61 = vadd.f32 %v2098_v59, %v828_v42  ;;  %v1967_v62 = vpack.c.bf16 %v2096_v58, %v2098_v59 }
 0x4cb   :  { %1968 = vmatprep.subr.bf16.mxu1 %v1967_v62 }
 0x4cc   :  { %1970 = vmatpush3.bf16.msra.mxu1 %v1967_v62 }
 0x4cd   :  { %1901 = vmatprep.subr.mxu1 %v1634_v29 }
 0x4cf   :  { %1874 = vmatmul.mubr.msk.f32.vlgmr.msra.gmra.mrb[8].mxu1 %vm184_vm1, %v2310_v17 }
 0x4d0   :  { %1876 = vmatprep.mubr.msk.f32.mxu1 %vm184_vm1, %v2312_v18  ;;  %1902 = vmatpush3.msra.mxu1 %v1634_v29 }
 0x4d3   :  { %1877 = vmatmul.mubr.msk.f32.gmra.mrb[10].mxu1 %vm184_vm1, %v2318_v19 }
 0x4d4   :  { %1903 = vmatprep.mubr.msk.f32.mxu1 %vm86_vm0, %v2267_v2 }
 0x4d7   :  { %1904 = vmatmul.mubr.msk.f32.vlgmr.msra.gmra.mrb[12].mxu1 %vm86_vm0, %v2272_v3 }
 0x4d8   :  { %1906 = vmatprep.mubr.msk.f32.mxu1 %vm86_vm0, %v2279_v6 }
 0x4db   :  { %1907 = vmatmul.mubr.msk.f32.gmra.mrb[14].mxu1 %vm86_vm0, %v2290_v11 }
 0x4dc   :  { %1917 = vmatprep.mubr.msk.f32.mxu1 %vm184_vm1, %v2298_v14 }
 0x5a2   :  { %v1875_v0 = vpop.f32.mrb[8].mxu1 }
 0x5a3   :  { %v2007_v2 = vadd.f32 %v1875_v0, %v2339_v23  ;;  %v1163_v1 = vpop.f32.mrb[9].mxu1 }
 0x5a4   :  { %v2008_v4 = vadd.f32 %v1163_v1, %v2335_v21 }
 0x5a5   :  { %2099 = vtanh.f32 %v2007_v2 }
 0x5a6   :  { %2101 = vtanh.f32 %v2008_v4  ;;  %v1878_v5 = vpop.f32.mrb[10].mxu1 }
 0x5a7   :  { %v2009_v7 = vadd.f32 %v1878_v5, %v2343_v28  ;;  %v1173_v8 = vpop.f32.mrb[11].mxu1 }
 0x5a8   :  { %v2010_v9 = vadd.f32 %v1173_v8, %v2337_v22 }
 0x5a9   :  { %2103 = vtanh.f32 %v2009_v7 }
 0x5aa   :  { %2105 = vtanh.f32 %v2010_v9 }
 0x5af   :  { %v2100_v10 = vpop.eup %2099 }
 0x5b0   :  { %v2102_v12 = vpop.eup %2101  ;;  %v1187_v13 = vadd.f32 %v2100_v10, %v1007_v55 }
 0x5b1   :  { %v1186_v15 = vadd.f32 %v2102_v12, %v1006_v56  ;;  %v1971_v16 = vpack.c.bf16 %v2100_v10, %v2102_v12 }
 0x5b3   :  { %v2104_v20 = vpop.eup %2103  ;;  %1972 = vmatprep.subr.bf16.mxu0 %v1971_v16 }
 0x5b4   :  { %v2106_v24 = vpop.eup %2105  ;;  %v1189_v25 = vadd.f32 %v2104_v20, %v1009_v60  ;;  %1974 = vmatpush3.bf16.msra.mxu0 %v1971_v16 }
 0x5b5   :  { %v1188_v26 = vadd.f32 %v2106_v24, %v1008_v61  ;;  %v1975_v27 = vpack.c.bf16 %v2104_v20, %v2106_v24 }
 0x5b7   :  { %1976 = vmatprep.subr.bf16.mxu0 %v1975_v27 }
 0x5b8   :  { %1978 = vmatpush3.bf16.msra.mxu0 %v1975_v27 }
 0x5bb   :  { %1896 = vmatmul.mubr.msk.f32.vlgmr.msra.gmra.mrb[12].mxu0 %vm184_vm1, %v2310_v17 }
 0x5bc   :  { %1898 = vmatprep.mubr.msk.f32.mxu0 %vm184_vm1, %v2312_v18 }
 0x5bf   :  { %1899 = vmatmul.mubr.msk.f32.gmra.mrb[14].mxu0 %vm184_vm1, %v2318_v19 }
 0x68e   :  { %v1897_v30 = vpop.f32.mrb[12].mxu0 }
 0x68f   :  { %v2011_v31 = vadd.f32 %v1897_v30, %v2339_v23  ;;  %v1343_v32 = vpop.f32.mrb[13].mxu0 }
 0x690   :  { %v2012_v33 = vadd.f32 %v1343_v32, %v2335_v21 }
 0x691   :  { %2107 = vtanh.f32 %v2011_v31 }
 0x692   :  { %2109 = vtanh.f32 %v2012_v33  ;;  %v1900_v34 = vpop.f32.mrb[14].mxu0 }
 0x693   :  { %v2013_v3 = vadd.f32 %v1900_v34, %v2343_v28  ;;  %v1353_v35 = vpop.f32.mrb[15].mxu0 }
 0x694   :  { %v2014_v6 = vadd.f32 %v1353_v35, %v2337_v22 }
 0x695   :  { %2111 = vtanh.f32 %v2013_v3 }
 0x696   :  { %2113 = vtanh.f32 %v2014_v6 }
 0x69b   :  { %v2108_v11 = vpop.eup %2107 }
 0x69c   :  { %v2110_v36 = vpop.eup %2109  ;;  %v1367_v37 = vadd.f32 %v2108_v11, %v1187_v13 }
 0x69d   :  { %v1366_v14 = vadd.f32 %v2110_v36, %v1186_v15  ;;  %v1979_v38 = vpack.c.bf16 %v2108_v11, %v2110_v36 }
 0x69f   :  { %v2112_v39 = vpop.eup %2111  ;;  %1980 = vmatprep.subr.bf16.mxu1 %v1979_v38 }
 0x6a0   :  { %v2114_v40 = vpop.eup %2113  ;;  %v1369_v41 = vadd.f32 %v2112_v39, %v1189_v25  ;;  %1982 = vmatpush3.bf16.msra.mxu1 %v1979_v38 }
 0x6a1   :  { %v1368_v42 = vadd.f32 %v2114_v40, %v1188_v26  ;;  %v1983_v43 = vpack.c.bf16 %v2112_v39, %v2114_v40 }
 0x6a3   :  { %1984 = vmatprep.subr.bf16.mxu1 %v1983_v43 }
 0x6a4   :  { %1986 = vmatpush3.bf16.msra.mxu1 %v1983_v43 }
 0x6a7   :  { %1918 = vmatmul.mubr.msk.f32.vlgmr.msra.gmra.mrb[12].mxu1 %vm184_vm1, %v2310_v17 }
 0x6a8   :  { %1920 = vmatprep.mubr.msk.f32.mxu1 %vm184_vm1, %v2312_v18 }
 0x6ab   :  { %1921 = vmatmul.mubr.msk.f32.gmra.mrb[14].mxu1 %vm184_vm1, %v2318_v19 }
 0x77a   :  { %v1919_v44 = vpop.f32.mrb[12].mxu1 }
 0x77b   :  { %v2015_v45 = vadd.f32 %v1919_v44, %v2339_v23  ;;  %v1523_v46 = vpop.f32.mrb[13].mxu1 }
 0x77c   :  { %v2016_v47 = vadd.f32 %v1523_v46, %v2335_v21 }
 0x77d   :  { %2115 = vtanh.f32 %v2015_v45 }
 0x77e   :  { %2117 = vtanh.f32 %v2016_v47  ;;  %v1922_v48 = vpop.f32.mrb[14].mxu1 }
 0x77f   :  { %v2017_v49 = vadd.f32 %v1922_v48, %v2343_v28  ;;  %v1533_v50 = vpop.f32.mrb[15].mxu1 }
 0x780   :  { %v2018_v17 = vadd.f32 %v1533_v50, %v2337_v22 }
 0x781   :  { %2119 = vtanh.f32 %v2017_v49 }
 0x782   :  { %2121 = vtanh.f32 %v2018_v17 }
 0x787   :  { %v2116_v18 = vpop.eup %2115 }
 0x788   :  { %v2118_v51 = vpop.eup %2117  ;;  %v1547_v52 = vadd.f32 %v2116_v18, %v1367_v37 }
 0x789   :  { %v1546_v19 = vadd.f32 %v2118_v51, %v1366_v14 }
 0x78a   :  { %1551 = vst [vmem:[#allocation7 + $0x8] sm:$0xff] %v1547_v52 }
 0x78b   :  { %v2120_v23 = vpop.eup %2119  ;;  %1550 = vst [vmem:[#allocation7] sm:$0xff] %v1546_v19 }
 0x78c   :  { %v2122_v21 = vpop.eup %2121  ;;  %v1549_v53 = vadd.f32 %v2120_v23, %v1369_v41 }
 0x78d   :  { %v1548_v54 = vadd.f32 %v2122_v21, %v1368_v42 }
 0x78e   :  { %1553 = vst [vmem:[#allocation7 + $0x18] sm:$0xff] %v1549_v53 }
 0x78f   :  { %1552 = vst [vmem:[#allocation7 + $0x10] sm:$0xff] %v1548_v54 }
 0x790   :  { %2178 = shalt.err (!%p2175_p6)
}
 0x791   :  { %s2179_s26 = scalar_lea.hbm %s2529_s5, 512 }
 0x792   :  { %p2180_p7 = scmp.ne.s32.totalorder %s2529_s5, %s2179_s26  ;;  %p2183_p8 = scmp.lt.u32.totalorder %s2179_s26, %s2529_s5 }
 0x794   :  { %p2185_p9 = pnand %p2183_p8, %p2180_p7 }
 0x796   :  { %2188 = shalt.err (!%p2185_p9)
}
 0x797   :  { %1565 = dma.vmem_to_hbm [thread:$0]  %s1560_s23, 512, %s2529_s5, [#allocation4], %s2196_s28, %s2196_s28, %s2197_s29  }
 0x798   :  { %2193 = dma.done.wait [#allocation4], 512  }
 0x799   :  { %2194 = vsyncadd [#allocation4], 4294966784 }
 0x79a   :  { %1569 = vsyncpa [#allocation3], 1 }
 0x79b   :  { %1570 = vsyncpa [#allocation6], 1 }
 0x79c   :  { %1571 = vsyncpa [#allocation4], 1 }

</bundles_post_ra>
